<compile_context>
chip_gen: v6e
topology: v6e:2x2x1
jax: 0.10.0
libtpu: 0.0.40
codegen_flags: <defaults>
</compile_context>

<pallas_src>
import functools

import jax
import jax.numpy as jnp
from jax import lax
from jax.experimental import pallas as pl
from jax.experimental.pallas import tpu as pltpu


# ----------------------------- kernel -----------------------------

def _loss_kernel(x_ref, t_ref, o_ref, *, s_true):
    """One row-block.

    x_ref: (RB, S_pad)   RB = TBN * C rows of the flattened (N*C, S) output
    t_ref: (TBN, S_pad)  the TBN matching label rows
    o_ref: (1, 8, 128)   lane 0 = KL partial, 1 = CC partial, 2 = MSE partial
    """
    rb, s_pad = x_ref.shape
    tbn = t_ref.shape[0]
    c = rb // tbn

    x = x_ref[...].astype(jnp.float32)            # (RB, S)
    t = t_ref[...].astype(jnp.float32)            # (TBN, S)

    # Broadcast each batch item's label row across its C channel rows
    # (sublane-dense, done once and reused by KL / CC / MSE).
    parts = [jnp.broadcast_to(t[j:j + 1, :], (c, s_pad)) for j in range(tbn)]
    tb = parts[0] if tbn == 1 else jnp.concatenate(parts, axis=0)   # (RB, S)

    # ---- per-row statistics (row = one (n, c) instance) ----------------------
    if s_pad != s_true:
        lane = lax.broadcasted_iota(jnp.int32, x.shape, 1)
        x_for_max = jnp.where(lane < s_true, x, -jnp.inf)   # mask the lane pad
    else:
        x_for_max = x
    x_max = jnp.max(x_for_max, axis=-1, keepdims=True)      # (RB, 1)
    x_sum = jnp.sum(x, axis=-1, keepdims=True)
    x_sq = jnp.sum(x * x, axis=-1, keepdims=True)
    xt = jnp.sum(x * tb, axis=-1, keepdims=True)
    t_sum = jnp.sum(tb, axis=-1, keepdims=True)
    t_sq = jnp.sum(tb * tb, axis=-1, keepdims=True)

    # ---------------- KL_div: sum over the tile of (a + b) --------------------
    p = x * pl.reciprocal(x_sum)          # == (x / max) / sum(x / max)
    q = tb * pl.reciprocal(t_sum)
    a = q * jnp.log(q * pl.reciprocal(p + 1e-6, approx=True) + 1e-6)
    b = p * jnp.log(p * pl.reciprocal(q + 1e-6, approx=True) + 1e-6)
    kl_part = jnp.sum(a + b)

    # ---------------- modified MSE (ends the live range of x / xm) ------------
    xm = x * pl.reciprocal(x_max)
    d = xm - tb
    mse_part = jnp.sum(d * d * pl.reciprocal(1.1 - tb, approx=True))

    # ---------------- CC from row moments only (no (RB,S) intermediates) ------
    inv_s = 1.0 / float(s_true)
    mx = x_sum * inv_s
    mt = t_sum * inv_s
    varx = x_sq * inv_s - mx * mx
    vart = t_sq * inv_s - mt * mt
    rx = lax.rsqrt(varx + 1e-5)            # F.instance_norm default eps
    rt = lax.rsqrt(vart + 1e-5)
    num = (xt - float(s_true) * mx * mt) * (rx * rt)        # == sum(xn * tn)
    out_sq = float(s_true) * varx * (rx * rx)               # == sum(xn * xn)
    tar_sq = float(s_true) * vart * (rt * rt)               # == sum(tn * tn)
    cc_part = jnp.sum(num / (jnp.sqrt(out_sq * tar_sq) + 1e-6))

    # ---- lane-dense partial-sum tile: lane 0 = KL, 1 = CC, 2 = MSE -----------
    lane_ix = lax.broadcasted_iota(jnp.int32, o_ref.shape, 2)
    o_ref[...] = jnp.where(lane_ix == 0, kl_part,
                 jnp.where(lane_ix == 1, cc_part,
                 jnp.where(lane_ix == 2, mse_part, 0.0)))


# ----------------------------- sizing helpers -----------------------------

_VMEM_LIMIT_CACHE = None


def _vmem_limit_bytes():
    """Generation-aware scoped-VMEM request (leaves ~16 MiB headroom)."""
    global _VMEM_LIMIT_CACHE
    if _VMEM_LIMIT_CACHE is not None:
        return _VMEM_LIMIT_CACHE
    phys = None
    try:
        phys = int(pltpu.get_tpu_info().vmem_capacity_bytes)
    except Exception:
        phys = None
    if phys is None:
        try:
            kind = jax.devices()[0].device_kind.lower()
            if ("v5" in kind) or ("v6" in kind):
                phys = 128 * 1024 * 1024
        except Exception:
            pass
    if phys is None:
        phys = 64 * 1024 * 1024  # conservative (v7x-sized) default
    _VMEM_LIMIT_CACHE = int(min(96 * 1024 * 1024,
                                max(32 * 1024 * 1024, phys - 16 * 1024 * 1024)))
    return _VMEM_LIMIT_CACHE


def _pick_batch_tile(n, c, s_pad, x_isz, t_isz, vmem_limit):
    """Batch items per block (TBN).  Block rows RB = TBN*C.

    Only TBN values that give layout-legal blocks are considered
    (TBN == N, or TBN a multiple of the sublane tile for the input dtype).
    The cost model counts double-buffered inputs + ~7 live f32 (RB, S)
    intermediates; input blocks are targeted at <= 4 MiB so the grid keeps
    several steps for pipelining.
    """
    sub = min(x_isz, t_isz)
    rt = 8 if sub >= 4 else (16 if sub == 2 else 32)   # sublane tile rows

    budget = max(vmem_limit - (4 << 20), 8 << 20)
    target_in = 4 << 20

    legal = [t for t in range(1, n + 1) if n % t == 0 and (t == n or t % rt == 0)]
    best = min(legal)          # fallback (may still be too big -> spatial-tiling TODO)
    best_key = None
    for tbn in legal:
        rb = tbn * c
        rb_pad = -(-rb // 8) * 8
        tbn_pad = -(-tbn // 8) * 8
        cost = (2 * (rb_pad * s_pad * x_isz + tbn_pad * s_pad * t_isz)  # dbl-buffered in
                + 7 * rb_pad * s_pad * 4)                               # live f32 temps
        if cost > budget:
            continue
        dense = (rb % rt == 0)
        small_enough = rb * s_pad * x_isz <= target_in
        key = (dense, small_enough, tbn if small_enough else -tbn)
        if best_key is None or key > best_key:
            best, best_key = tbn, key
    return best


# ----------------------------- pallas wrapper -----------------------------

@jax.jit
def _pallas_losses(output_nchw, label):
    """Returns (KL_raw, CC_raw, MSE) for one pyramid level."""
    n, c, h, w = output_nchw.shape
    s = h * w
    s_pad = -(-s // 128) * 128

    x2 = output_nchw.reshape(n * c, s)        # native dtype (f32 or bf16), no cast
    t2 = label.reshape(n, s)
    if s_pad != s:
        x2 = jnp.pad(x2, ((0, 0), (0, s_pad - s)))
        t2 = jnp.pad(t2, ((0, 0), (0, s_pad - s)))

    vmem_limit = _vmem_limit_bytes()
    tbn = _pick_batch_tile(n, c, s_pad, x2.dtype.itemsize, t2.dtype.itemsize,
                           vmem_limit)
    rb = tbn * c
    num_blocks = n // tbn
    # TODO(synk): very large C*H*W still needs a spatial ('arbitrary') grid axis
    # with carried per-row max/sum stats (or a two-pass scheme); a single
    # (RB, S) block is assumed to fit VMEM here.  Likewise, for tiny N the grid
    # can collapse to 1-2 steps, which defeats double-buffering.

    kernel = functools.partial(_loss_kernel, s_true=s)

    raw = pl.pallas_call(
        kernel,
        out_shape=jax.ShapeDtypeStruct((num_blocks, 8, 128), jnp.float32),
        grid_spec=pltpu.PrefetchScalarGridSpec(
            num_scalar_prefetch=0,
            grid=(num_blocks,),
            in_specs=[
                pl.BlockSpec((rb, s_pad), lambda i: (i, 0)),
                pl.BlockSpec((tbn, s_pad), lambda i: (i, 0)),
            ],
            out_specs=pl.BlockSpec((1, 8, 128), lambda i: (i, 0, 0)),
        ),
        compiler_params=pltpu.CompilerParams(
            dimension_semantics=("parallel",),
            vmem_limit_bytes=int(vmem_limit),
        ),
    )(x2, t2)

    parts = jnp.sum(raw[:, 0, :], axis=0)     # reduce per-block partial sums
    kl = parts[0] / (n * 2.0)
    cc = parts[1] / (n * c)
    mse = parts[2] / (n * c * s)
    return kl, cc, mse


# ----------------------------- pure-JAX reference -----------------------------

def _ref_losses(output, label):
    n, c, h, w = output.shape
    x = output.astype(jnp.float32)
    t = label.astype(jnp.float32)[:, None]            # (N, 1, H, W)
    x_max = x.max(axis=(2, 3), keepdims=True)
    xm = x / x_max
    p = xm / xm.sum(axis=(2, 3), keepdims=True)
    q = t / t.sum(axis=(2, 3), keepdims=True)
    a = q * jnp.log(q / (p + 1e-6) + 1e-6)
    b = p * jnp.log(p / (q + 1e-6) + 1e-6)
    kl = (a.sum() + b.sum()) / (n * 2.0)

    def inorm(v):
        m = v.mean(axis=(2, 3), keepdims=True)
        var = ((v - m) ** 2).mean(axis=(2, 3), keepdims=True)
        return (v - m) / jnp.sqrt(var + 1e-5)

    xn, tn = inorm(x), inorm(t)
    num = (xn * tn).sum(axis=(2, 3))
    osq = (xn * xn).sum(axis=(2, 3))
    tsq = (tn * tn).sum(axis=(2, 3))
    cc = (num / (jnp.sqrt(osq * tsq) + 1e-6)).mean()
    mse = jnp.mean((xm - t) ** 2 / (1.1 - t))
    return kl, cc, mse


# ----------------------------- module glue -----------------------------

class _LossCfg:
    def __init__(self, kl_alpha=1.0, cc_alpha=1.0, mse_alpha=1.0, alpha_loss=()):
        self.KL_ALPHA = kl_alpha
        self.CC_ALPHA = cc_alpha
        self.MSE_ALPHA = mse_alpha
        self.ALPHA_LOSS = list(alpha_loss)


class _Cfg:
    def __init__(self, loss_cfg):
        self.LOSS = loss_cfg


def mod_mse_kl_cc_loss_ml_forward(outputs, label, fixmap, cfg, debug_msg=True):
    """JAX/Pallas equivalent of ModMSE_KL_CC_Loss_ML.forward."""
    assert isinstance(outputs, list)
    del fixmap  # unused by the reference forward
    losses = []
    final_loss = 0.0
    for idx, output in enumerate(outputs):
        if output.shape[-2:] != label.shape[-2:]:
            # TODO(synk): F.upsample_bilinear(align_corners=True) label-resize branch
            # (and the resulting broadcast inside loss_MSE) is not replicated.
            raise NotImplementedError("label/output spatial mismatch not supported")

        kl_raw, cc_raw, mse = _pallas_losses(output, label)

        loss_kl = jnp.where(jnp.isnan(kl_raw), 0.0, kl_raw)
        cc_score = jnp.where(jnp.isnan(cc_raw) | (cc_raw < 0.0), 0.0, cc_raw)
        loss_cc = 1.0 - cc_score

        loss = (loss_kl * cfg.LOSS.KL_ALPHA
                + loss_cc * cfg.LOSS.CC_ALPHA
                + mse * cfg.LOSS.MSE_ALPHA)

        if len(cfg.LOSS.ALPHA_LOSS) == 0:
            final_loss = final_loss + loss
        else:
            final_loss = final_loss + loss * cfg.LOSS.ALPHA_LOSS[idx]
        losses.append(loss)

    final = final_loss / len(losses)
    if debug_msg:
        # float(l) forces a device->host sync per level; keep it gated.
        msg = '\t' + ' '.join('L{}:{:.3f}'.format(i, float(l)) for i, l in enumerate(losses))
    else:
        msg = ''
    return final, msg


if __name__ == "__main__":
    key = jax.random.PRNGKey(0)
    k1, k2, k3 = jax.random.split(key, 3)

    N, C, H, W = 2, 4, 16, 16
    # Saliency-like positive maps (avoid degenerate zero rows).
    out1 = jax.random.uniform(k1, (N, C, H, W), jnp.float32, minval=0.05, maxval=1.0)
    out2 = jax.random.uniform(k2, (N, C, H, W), jnp.float32, minval=0.05, maxval=1.0)
    label = jax.random.uniform(k3, (N, H, W), jnp.float32, minval=0.0, maxval=0.9)
    fixmap = jnp.zeros((N, H, W), jnp.float32)  # unused, kept for signature parity

    cfg = _Cfg(_LossCfg(kl_alpha=1.0, cc_alpha=0.5, mse_alpha=2.0, alpha_loss=()))

    # Correctness check against the pure-JAX reference (f32 inputs).
    for o in (out1, out2):
        got = _pallas_losses(o, label)
        want = _ref_losses(o, label)
        for g, wv in zip(got, want):
            assert jnp.allclose(g, wv, rtol=3e-3, atol=3e-3), (g, wv)

    # bf16 inputs are accepted at the pallas_call boundary (cast to f32 in VMEM).
    out_bf = out1.astype(jnp.bfloat16)
    lab_bf = label.astype(jnp.bfloat16)
    got_bf = _pallas_losses(out_bf, lab_bf)
    want_bf = _ref_losses(out_bf, lab_bf)
    for g, wv in zip(got_bf, want_bf):
        assert jnp.allclose(g, wv, rtol=1e-2, atol=1e-2), (g, wv)

    final_loss, msg = mod_mse_kl_cc_loss_ml_forward(
        [out1, out2], label, fixmap, cfg, debug_msg=False)
    jax.block_until_ready(final_loss)
    print("KERNEL_OK")
</pallas_src>

<mosaic_0001>
module attributes {stable_mosaic.version = 11 : i64} {
  func.func @_loss_kernel(%arg0: i32, %arg1: memref<8x256xf32, #tpu.memory_space<vmem>>, %arg2: memref<2x256xf32, #tpu.memory_space<vmem>>, %arg3: memref<1x8x128xf32, #tpu.memory_space<vmem>>) attributes {dimension_semantics = [#tpu.dimension_semantics<parallel>], iteration_bounds = array<i64: 1>, scalar_prefetch = 0 : i64, scratch_operands = 0 : i64, tpu.core_type = #tpu.core_type<tc>, window_params = [{transform_indices = @transform_0, window_bounds = array<i64: 8, 256>}, {transform_indices = @transform_1, window_bounds = array<i64: 2, 256>}, {transform_indices = @transform_2, window_bounds = array<i64: 1, 8, 128>}]} {
    %c0 = arith.constant 0 : index
    %c0_0 = arith.constant 0 : index
    %0 = vector.load %arg1[%c0, %c0_0] : memref<8x256xf32, #tpu.memory_space<vmem>>, vector<8x256xf32>
    %c0_1 = arith.constant 0 : index
    %c0_2 = arith.constant 0 : index
    %1 = vector.load %arg2[%c0_1, %c0_2] : memref<2x256xf32, #tpu.memory_space<vmem>>, vector<2x256xf32>
    %2 = vector.extract_strided_slice %1 {offsets = [0, 0], sizes = [1, 256], strides = [1, 1]} : vector<2x256xf32> to vector<1x256xf32>
    %3 = vector.shape_cast %2 : vector<1x256xf32> to vector<1x256xf32>
    %4 = vector.broadcast %3 : vector<1x256xf32> to vector<4x256xf32>
    %5 = vector.extract_strided_slice %1 {offsets = [1, 0], sizes = [1, 256], strides = [1, 1]} : vector<2x256xf32> to vector<1x256xf32>
    %6 = vector.shape_cast %5 : vector<1x256xf32> to vector<1x256xf32>
    %7 = vector.broadcast %6 : vector<1x256xf32> to vector<4x256xf32>
    %8 = tpu.concatenate %4, %7 in 0 : vector<4x256xf32>, vector<4x256xf32> -> vector<8x256xf32>
    %cst = arith.constant dense<0xFF800000> : vector<8xf32>
    %9 = vector.multi_reduction <maximumf>, %0, %cst [1] : vector<8x256xf32> to vector<8xf32>
    %10 = vector.shape_cast %9 : vector<8xf32> to vector<8x1xf32>
    %cst_3 = arith.constant dense<0.000000e+00> : vector<8xf32>
    %11 = vector.multi_reduction <add>, %0, %cst_3 [1] : vector<8x256xf32> to vector<8xf32>
    %12 = vector.shape_cast %11 : vector<8xf32> to vector<8x1xf32>
    %13 = arith.mulf %0, %0 : vector<8x256xf32>
    %cst_4 = arith.constant dense<0.000000e+00> : vector<8xf32>
    %14 = vector.multi_reduction <add>, %13, %cst_4 [1] : vector<8x256xf32> to vector<8xf32>
    %15 = vector.shape_cast %14 : vector<8xf32> to vector<8x1xf32>
    %16 = arith.mulf %0, %8 : vector<8x256xf32>
    %cst_5 = arith.constant dense<0.000000e+00> : vector<8xf32>
    %17 = vector.multi_reduction <add>, %16, %cst_5 [1] : vector<8x256xf32> to vector<8xf32>
    %18 = vector.shape_cast %17 : vector<8xf32> to vector<8x1xf32>
    %cst_6 = arith.constant dense<0.000000e+00> : vector<8xf32>
    %19 = vector.multi_reduction <add>, %8, %cst_6 [1] : vector<8x256xf32> to vector<8xf32>
    %20 = vector.shape_cast %19 : vector<8xf32> to vector<8x1xf32>
    %21 = arith.mulf %8, %8 : vector<8x256xf32>
    %cst_7 = arith.constant dense<0.000000e+00> : vector<8xf32>
    %22 = vector.multi_reduction <add>, %21, %cst_7 [1] : vector<8x256xf32> to vector<8xf32>
    %23 = vector.shape_cast %22 : vector<8xf32> to vector<8x1xf32>
    %24 = tpu.reciprocal %12 : vector<8x1xf32> -> vector<8x1xf32>
    %25 = vector.broadcast %24 : vector<8x1xf32> to vector<8x256xf32>
    %26 = arith.mulf %0, %25 : vector<8x256xf32>
    %27 = tpu.reciprocal %20 : vector<8x1xf32> -> vector<8x1xf32>
    %28 = vector.broadcast %27 : vector<8x1xf32> to vector<8x256xf32>
    %29 = arith.mulf %8, %28 : vector<8x256xf32>
    %cst_8 = arith.constant 9.99999997E-7 : f32
    %30 = vector.broadcast %cst_8 : f32 to vector<8x256xf32>
    %31 = arith.addf %26, %30 : vector<8x256xf32>
    %32 = tpu.reciprocal %31 {approx = true} : vector<8x256xf32> -> vector<8x256xf32>
    %33 = arith.mulf %29, %32 : vector<8x256xf32>
    %cst_9 = arith.constant 9.99999997E-7 : f32
    %34 = vector.broadcast %cst_9 : f32 to vector<8x256xf32>
    %35 = arith.addf %33, %34 : vector<8x256xf32>
    %36 = math.log %35 : vector<8x256xf32>
    %37 = arith.mulf %29, %36 : vector<8x256xf32>
    %cst_10 = arith.constant 9.99999997E-7 : f32
    %38 = vector.broadcast %cst_10 : f32 to vector<8x256xf32>
    %39 = arith.addf %29, %38 : vector<8x256xf32>
    %40 = tpu.reciprocal %39 {approx = true} : vector<8x256xf32> -> vector<8x256xf32>
    %41 = arith.mulf %26, %40 : vector<8x256xf32>
    %cst_11 = arith.constant 9.99999997E-7 : f32
    %42 = vector.broadcast %cst_11 : f32 to vector<8x256xf32>
    %43 = arith.addf %41, %42 : vector<8x256xf32>
    %44 = math.log %43 : vector<8x256xf32>
    %45 = arith.mulf %26, %44 : vector<8x256xf32>
    %46 = arith.addf %37, %45 : vector<8x256xf32>
    %47 = vector.shape_cast %46 : vector<8x256xf32> to vector<1x8x256xf32>
    %cst_12 = arith.constant dense<0.000000e+00> : vector<1xf32>
    %48 = vector.multi_reduction <add>, %47, %cst_12 [1, 2] : vector<1x8x256xf32> to vector<1xf32>
    %49 = vector.shape_cast %48 : vector<1xf32> to vector<1x1x1xf32>
    %50 = vector.extract %49[0, 0, 0] : f32 from vector<1x1x1xf32>
    %51 = tpu.reciprocal %10 : vector<8x1xf32> -> vector<8x1xf32>
    %52 = vector.broadcast %51 : vector<8x1xf32> to vector<8x256xf32>
    %53 = arith.mulf %0, %52 : vector<8x256xf32>
    %54 = arith.subf %53, %8 : vector<8x256xf32>
    %55 = arith.mulf %54, %54 : vector<8x256xf32>
    %cst_13 = arith.constant 1.100000e+00 : f32
    %56 = vector.broadcast %cst_13 : f32 to vector<8x256xf32>
    %57 = arith.subf %56, %8 : vector<8x256xf32>
    %58 = tpu.reciprocal %57 {approx = true} : vector<8x256xf32> -> vector<8x256xf32>
    %59 = arith.mulf %55, %58 : vector<8x256xf32>
    %60 = vector.shape_cast %59 : vector<8x256xf32> to vector<1x8x256xf32>
    %cst_14 = arith.constant dense<0.000000e+00> : vector<1xf32>
    %61 = vector.multi_reduction <add>, %60, %cst_14 [1, 2] : vector<1x8x256xf32> to vector<1xf32>
    %62 = vector.shape_cast %61 : vector<1xf32> to vector<1x1x1xf32>
    %63 = vector.extract %62[0, 0, 0] : f32 from vector<1x1x1xf32>
    %cst_15 = arith.constant 3.906250e-03 : f32
    %64 = vector.broadcast %cst_15 : f32 to vector<8x1xf32>
    %65 = arith.mulf %12, %64 : vector<8x1xf32>
    %cst_16 = arith.constant 3.906250e-03 : f32
    %66 = vector.broadcast %cst_16 : f32 to vector<8x1xf32>
    %67 = arith.mulf %20, %66 : vector<8x1xf32>
    %cst_17 = arith.constant 3.906250e-03 : f32
    %68 = vector.broadcast %cst_17 : f32 to vector<8x1xf32>
    %69 = arith.mulf %15, %68 : vector<8x1xf32>
    %70 = arith.mulf %65, %65 : vector<8x1xf32>
    %71 = arith.subf %69, %70 : vector<8x1xf32>
    %cst_18 = arith.constant 3.906250e-03 : f32
    %72 = vector.broadcast %cst_18 : f32 to vector<8x1xf32>
    %73 = arith.mulf %23, %72 : vector<8x1xf32>
    %74 = arith.mulf %67, %67 : vector<8x1xf32>
    %75 = arith.subf %73, %74 : vector<8x1xf32>
    %cst_19 = arith.constant 9.99999974E-6 : f32
    %76 = vector.broadcast %cst_19 : f32 to vector<8x1xf32>
    %77 = arith.addf %71, %76 : vector<8x1xf32>
    %78 = math.rsqrt %77 : vector<8x1xf32>
    %cst_20 = arith.constant 9.99999974E-6 : f32
    %79 = vector.broadcast %cst_20 : f32 to vector<8x1xf32>
    %80 = arith.addf %75, %79 : vector<8x1xf32>
    %81 = math.rsqrt %80 : vector<8x1xf32>
    %cst_21 = arith.constant 2.560000e+02 : f32
    %82 = vector.broadcast %cst_21 : f32 to vector<8x1xf32>
    %83 = arith.mulf %82, %65 : vector<8x1xf32>
    %84 = arith.mulf %83, %67 : vector<8x1xf32>
    %85 = arith.subf %18, %84 : vector<8x1xf32>
    %86 = arith.mulf %78, %81 : vector<8x1xf32>
    %87 = arith.mulf %85, %86 : vector<8x1xf32>
    %cst_22 = arith.constant 2.560000e+02 : f32
    %88 = vector.broadcast %cst_22 : f32 to vector<8x1xf32>
    %89 = arith.mulf %88, %71 : vector<8x1xf32>
    %90 = arith.mulf %78, %78 : vector<8x1xf32>
    %91 = arith.mulf %89, %90 : vector<8x1xf32>
    %cst_23 = arith.constant 2.560000e+02 : f32
    %92 = vector.broadcast %cst_23 : f32 to vector<8x1xf32>
    %93 = arith.mulf %92, %75 : vector<8x1xf32>
    %94 = arith.mulf %81, %81 : vector<8x1xf32>
    %95 = arith.mulf %93, %94 : vector<8x1xf32>
    %96 = arith.mulf %91, %95 : vector<8x1xf32>
    %97 = math.sqrt %96 : vector<8x1xf32>
    %cst_24 = arith.constant 9.99999997E-7 : f32
    %98 = vector.broadcast %cst_24 : f32 to vector<8x1xf32>
    %99 = arith.addf %97, %98 : vector<8x1xf32>
    %100 = arith.divf %87, %99 : vector<8x1xf32>
    %101 = vector.shape_cast %100 : vector<8x1xf32> to vector<1x8x1xf32>
    %cst_25 = arith.constant dense<0.000000e+00> : vector<1xf32>
    %102 = vector.multi_reduction <add>, %101, %cst_25 [1, 2] : vector<1x8x1xf32> to vector<1xf32>
    %103 = vector.shape_cast %102 : vector<1xf32> to vector<1x1x1xf32>
    %104 = vector.extract %103[0, 0, 0] : f32 from vector<1x1x1xf32>
    %105 = tpu.iota {dimensions = array<i32: 2>} : vector<1x8x128xi32>
    %c0_i32 = arith.constant 0 : i32
    %106 = vector.broadcast %c0_i32 : i32 to vector<1x8x128xi32>
    %107 = arith.cmpi eq, %105, %106 : vector<1x8x128xi32>
    %c1_i32 = arith.constant 1 : i32
    %108 = vector.broadcast %c1_i32 : i32 to vector<1x8x128xi32>
    %109 = arith.cmpi eq, %105, %108 : vector<1x8x128xi32>
    %c2_i32 = arith.constant 2 : i32
    %110 = vector.broadcast %c2_i32 : i32 to vector<1x8x128xi32>
    %111 = arith.cmpi eq, %105, %110 : vector<1x8x128xi32>
    %cst_26 = arith.constant 0.000000e+00 : f32
    %112 = vector.broadcast %63 : f32 to vector<1x8x128xf32>
    %113 = vector.broadcast %cst_26 : f32 to vector<1x8x128xf32>
    %114 = arith.select %111, %112, %113 : vector<1x8x128xi1>, vector<1x8x128xf32>
    %115 = vector.broadcast %104 : f32 to vector<1x8x128xf32>
    %116 = arith.select %109, %115, %114 : vector<1x8x128xi1>, vector<1x8x128xf32>
    %117 = vector.broadcast %50 : f32 to vector<1x8x128xf32>
    %118 = arith.select %107, %117, %116 : vector<1x8x128xi1>, vector<1x8x128xf32>
    %c0_27 = arith.constant 0 : index
    %c0_28 = arith.constant 0 : index
    %c0_29 = arith.constant 0 : index
    %119 = vector.load %arg3[%c0_27, %c0_28, %c0_29] : memref<1x8x128xf32, #tpu.memory_space<vmem>>, vector<1x8x128xf32>
    tpu.vector_store %arg3[%c0_27, %c0_28, %c0_29], %118 {strides = array<i32>} : memref<1x8x128xf32, #tpu.memory_space<vmem>>, vector<1x8x128xf32>,
    return
  }
  func.func @transform_0(%arg0: i32) -> (i32, i32) {
    %c0_i32 = arith.constant 0 : i32
    %c0_i32_0 = arith.constant 0 : i32
    return %arg0, %c0_i32 : i32, i32
  }
  func.func @transform_1(%arg0: i32) -> (i32, i32) {
    %c0_i32 = arith.constant 0 : i32
    %c0_i32_0 = arith.constant 0 : i32
    return %arg0, %c0_i32 : i32, i32
  }
  func.func @transform_2(%arg0: i32) -> (i32, i32, i32) {
    %c0_i32 = arith.constant 0 : i32
    %c0_i32_0 = arith.constant 0 : i32
    %c0_i32_1 = arith.constant 0 : i32
    return %arg0, %c0_i32, %c0_i32_0 : i32, i32, i32
  }
}

</mosaic_0001>

<bundles_post_ra>
// kernel: _pallas_losses.1
= control target key start
LH: loop header
LB: loop body
LE: loop exit
PB: predicated region body
PF: predicated region fallthrough
CT: control target
= control target key end

     0   :  { %v15_v0 = vlaneseq  ;;  %vm51_vm0 = vcmask 1043456   ;;  %vm181_vm3 = vcmask 7168   ;;  %s325_s0 = inlined_call_operand.vmem [shape: f32[8,256], index: 0, kind: input, shape index: {}]   ;;  %s326_s1 = inlined_call_operand.vmem [shape: f32[2,256], index: 1, kind: input, shape index: {}]   ;;  %s327_s2 = inlined_call_operand.vmem [shape: f32[1,8,128], index: 2, kind: output, shape index: {}]  }
   0x1   :  { %v266_v1 = vld [vmem:[%s325_s0] sm:$0xff]  ;;  %v271_v2 = vld [vmem:[%s325_s0 + $0x8] sm:$0xff] }
   0x2   :  { %v57_v3 = vadd.f32 %v271_v2, %v266_v1  ;;  %v60_v4 = vmul.f32 %v266_v1, %v266_v1  ;;  %v61_v5 = vmul.f32 %v271_v2, %v271_v2  ;;  %v16_v6 = vshrl.u32 %v15_v0, 7  ;;  %v13_v7 = vld [vmem:[%s326_s1] sm:$0xf] }
   0x3   :  { %v54_v29 = vmax.f32 %v266_v1, %v271_v2 }
   0x4   :  { %58 = vadd.xlane.f32.xlu0 %v57_v3  ;;  %v62_v8 = vadd.f32 %v61_v5, %v60_v4  ;;  %v17_v9 = vsub.s32 0, %v16_v6  ;;  %v21_v10 = vsub.s32 2, %v16_v6  ;;  %v35_v11 = vsub.s32 1, %v16_v6 }
   0x5   :  { %v39_v12 = vsub.s32 3, %v16_v6 }
   0x6   :  { %63 = vadd.xlane.f32.xlu1 %v62_v8  ;;  %v18_v13 = vrot.slane %v13_v7, %v17_v9  ;;  %v22_v14 = vrot.slane %v13_v7, %v21_v10  ;;  %v36_v15 = vrot.slane %v13_v7, %v35_v11 }
   0x7   :  { %v40_v16 = vrot.slane %v13_v7, %v39_v12 }
   0x8   :  { %v28_v17 = vrot.slane %v18_v13, %v17_v9  ;;  %v32_v18 = vrot.slane %v22_v14, %v17_v9  ;;  %v46_v19 = vrot.slane %v36_v15, %v35_v11 }
   0x9   :  { %v50_v20 = vrot.slane %v40_v16, %v35_v11 }
   0xa   :  { %v52_v21 = vsel %vm51_vm0, %v28_v17, %v46_v19 }
   0xb   :  { %v53_v22 = vsel %vm51_vm0, %v32_v18, %v50_v20  ;;  %v73_v23 = vmul.f32 %v52_v21, %v52_v21  ;;  %v65_v26 = vmul.f32 %v52_v21, %v266_v1  ;;  %v131_v43 = vsub.f32 1.1, %v52_v21 }
   0xc   :  { %v70_v24 = vadd.f32 %v53_v22, %v52_v21  ;;  %v74_v25 = vmul.f32 %v53_v22, %v53_v22  ;;  %v66_v27 = vmul.f32 %v53_v22, %v271_v2  ;;  %v132_v46 = vsub.f32 1.1, %v53_v22 }
   0xe   :  { %71 = vadd.xlane.f32.xlu0 %v70_v24  ;;  %v75_v28 = vadd.f32 %v74_v25, %v73_v23  ;;  %v67_v30 = vadd.f32 %v66_v27, %v65_v26 }
  0x10   :  { %76 = vadd.xlane.f32.xlu1 %v75_v28 }
  0x12   :  { %55 = vmax.xlane.f32.xlu0 %v54_v29 }
  0x14   :  { %68 = vadd.xlane.f32.xlu1 %v67_v30 }
  0x8d   :  { %v59_v31 = vpop.xlane.xlu0 %58 }
  0x8e   :  { %214 = vrcp.f32 %v59_v31  ;;  %v287_v32 = vmul.f32 0.00390625, %v59_v31 }
  0x8f   :  { %v64_v33 = vpop.xlane.xlu1 %63 }
  0x90   :  { %v150_v34 = vmul.f32 %v287_v32, %v287_v32  ;;  %v149_v35 = vmul.f32 0.00390625, %v64_v33 }
  0x92   :  { %v151_v36 = vsub.f32 %v149_v35, %v150_v34 }
  0x94   :  { %v155_v37 = vadd.f32 1e-05, %v151_v36  ;;  %v164_v7 = vmul.f32 256.0, %v151_v36 }
  0x97   :  { %v72_v38 = vpop.xlane.xlu0 %71 }
  0x98   :  { %216 = vrcp.f32 %v72_v38  ;;  %v291_v39 = vmul.f32 0.00390625, %v72_v38 }
  0x99   :  { %v77_v40 = vpop.xlane.xlu1 %76  ;;  %218 = vrsqrt.f32 %v155_v37 }
  0x9a   :  { %v153_v41 = vmul.f32 %v291_v39, %v291_v39  ;;  %v152_v42 = vmul.f32 0.00390625, %v77_v40 }
  0x9b   :  { %v215_v44 = vpop.eup %214  ;;  %v56_v45 = vpop.xlane.xlu0 %55 }
  0x9c   :  { %v154_v47 = vsub.f32 %v152_v42, %v153_v41  ;;  %220 = vrcp.f32 %v56_v45  ;;  %v296_v48 = vmul.f32 %v215_v44, %v266_v1  ;;  %v299_v49 = vmul.f32 %v215_v44, %v271_v2 }
  0x9d   :  { %222 = vrcp.f32 %v131_v43 }
  0x9e   :  { %v157_v50 = vadd.f32 1e-05, %v154_v47  ;;  %v84_v51 = vadd.f32 1e-06, %v296_v48  ;;  %v85_v52 = vadd.f32 1e-06, %v299_v49  ;;  %224 = vrcp.f32 %v132_v46 }
  0x9f   :  { %v167_v9 = vmul.f32 256.0, %v154_v47 }
  0xa0   :  { %226 = vrsqrt.f32 %v157_v50  ;;  %v159_v50 = vmul.f32 256.0, %v287_v32 }
  0xa1   :  { %228 = vrcp.f32 %v84_v51 }
  0xa2   :  { %230 = vrcp.f32 %v85_v52  ;;  %v69_v52 = vpop.xlane.xlu1 %68 }
  0xa5   :  { %v217_v53 = vpop.eup %216 }
  0xa6   :  { %v82_v54 = vmul.f32 %v217_v53, %v52_v21  ;;  %v303_v55 = vmul.f32 %v217_v53, %v53_v22  ;;  %v305_v56 = vpop.eup %218 }
  0xa7   :  { %v165_v3 = vmul.f32 %v305_v56, %v305_v56 }
  0xa8   :  { %v98_v57 = vadd.f32 1e-06, %v82_v54  ;;  %v99_v58 = vadd.f32 1e-06, %v303_v55 }
  0xa9   :  { %v221_v59 = vpop.eup %220  ;;  %v166_v14 = vmul.f32 %v165_v3, %v164_v7 }
  0xaa   :  { %232 = vrcp.f32 %v98_v57  ;;  %v125_v60 = vmul.f32 %v221_v59, %v266_v1  ;;  %v126_v61 = vmul.f32 %v221_v59, %v271_v2  ;;  %v223_v62 = vpop.eup %222  ;;  %v160_v57 = vmul.f32 %v159_v50, %v291_v39 }
  0xab   :  { %234 = vrcp.f32 %v99_v58  ;;  %v225_v63 = vpop.eup %224 }
  0xac   :  { %v127_v4 = vsub.f32 %v125_v60, %v52_v21  ;;  %v128_v5 = vsub.f32 %v126_v61, %v53_v22  ;;  %v161_v60 = vsub.f32 %v69_v52, %v160_v57 }
  0xad   :  { %v227_v6 = vpop.eup %226 }
  0xae   :  { %v229_v8 = vpop.eup %228  ;;  %v168_v10 = vmul.f32 %v227_v6, %v227_v6  ;;  %v129_v11 = vmul.f32 %v127_v4, %v127_v4  ;;  %v130_v12 = vmul.f32 %v128_v5, %v128_v5  ;;  %v162_v58 = vmul.f32 %v227_v6, %v305_v56 }
  0xaf   :  { %v231_v13 = vpop.eup %230  ;;  %v88_v15 = vmul.f32 %v229_v8, %v82_v54 }
  0xb0   :  { %v169_v1 = vmul.f32 %v168_v10, %v167_v9  ;;  %v135_v2 = vmul.f32 %v223_v62, %v129_v11  ;;  %v89_v16 = vmul.f32 %v231_v13, %v303_v55  ;;  %v136_v17 = vmul.f32 %v225_v63, %v130_v12 }
  0xb1   :  { %v90_v20 = vadd.f32 1e-06, %v88_v15  ;;  %v163_v61 = vmul.f32 %v162_v58, %v161_v60 }
  0xb2   :  { %v170_v18 = vmul.f32 %v169_v1, %v166_v14  ;;  %v137_v19 = vadd.f32 %v136_v17, %v135_v2  ;;  %v91_v21 = vadd.f32 1e-06, %v89_v16  ;;  %v193_v16 = vand.u32 127, %v15_v0 }
  0xb4   :  { %236 = vrsqrt.f32 %v170_v18  ;;  %138 = vadd.xlane.f32.xlu1 %v137_v19  ;;  %vm173_vm1 = vcmp.eq.f32.partialorder %v170_v18, inf  ;;  %v176_v30 = vand.u32 2147483648, %v170_v18  ;;  %vm175_vm2 = vcmp.eq.f32.partialorder %v170_v18, 0.0 }
  0xb5   :  { %238 = vlog2.f32 %v90_v20  ;;  %vm196_vm4 = vcmp.eq.s32.totalorder %v193_v16, 2  ;;  %vm195_vm5 = vcmp.eq.s32.totalorder %v193_v16, 1  ;;  %vm194_vm6 = vcmp.eq.s32.totalorder %v193_v16, 0 }
  0xb6   :  { %240 = vlog2.f32 %v91_v21 }
  0xb7   :  { %v233_v22 = vpop.eup %232 }
  0xb8   :  { %v235_v23 = vpop.eup %234  ;;  %v102_v24 = vmul.f32 %v233_v22, %v296_v48 }
  0xb9   :  { %v103_v25 = vmul.f32 %v235_v23, %v299_v49 }
  0xba   :  { %v104_v26 = vadd.f32 1e-06, %v102_v24 }
  0xbb   :  { %v105_v27 = vadd.f32 1e-06, %v103_v25 }
  0xbc   :  { %242 = vlog2.f32 %v104_v26 }
  0xbd   :  { %244 = vlog2.f32 %v105_v27 }
  0xc1   :  { %v237_v28 = vpop.eup %236 }
  0xc2   :  { %v172_v29 = vmul.f32 %v237_v28, %v170_v18  ;;  %v239_v33 = vpop.eup %238 }
  0xc3   :  { %v241_v35 = vpop.eup %240  ;;  %v93_v37 = vmul.f32 0.6931472, %v239_v33 }
  0xc4   :  { %v174_v31 = vsel %vm173_vm1, %v170_v18, %v172_v29  ;;  %v95_v40 = vmul.f32 0.6931472, %v241_v35 }
  0xc5   :  { %v177_v34 = vsel %vm175_vm2, %v176_v30, %v174_v31  ;;  %v96_v44 = vmul.f32 %v93_v37, %v82_v54 }
  0xc6   :  { %v178_v36 = vadd.f32 1e-06, %v177_v34  ;;  %v97_v46 = vmul.f32 %v95_v40, %v303_v55 }
  0xc8   :  { %246 = vrcp.f32 %v178_v36 }
  0xc9   :  { %v243_v38 = vpop.eup %242 }
  0xca   :  { %v245_v41 = vpop.eup %244  ;;  %v107_v42 = vmul.f32 0.6931472, %v243_v38 }
  0xcb   :  { %v109_v43 = vmul.f32 0.6931472, %v245_v41 }
  0xcc   :  { %v110_v45 = vmul.f32 %v107_v42, %v296_v48 }
  0xcd   :  { %v111_v47 = vmul.f32 %v109_v43, %v299_v49 }
  0xce   :  { %v112_v51 = vadd.f32 %v110_v45, %v96_v44 }
  0xcf   :  { %v113_v53 = vadd.f32 %v111_v47, %v97_v46 }
  0xd1   :  { %v114_v59 = vadd.f32 %v113_v53, %v112_v51 }
  0xd3   :  { %115 = vadd.xlane.f32.xlu0 %v114_v59 }
  0xd5   :  { %v247_v54 = vpop.eup %246 }
  0xd6   :  { %v180_v48 = vmul.f32 %v247_v54, %v163_v61 }
  0xd8   :  { %v182_v62 = vsel %vm181_vm3, %v180_v48, 0.0 }
  0xd9   :  { %183 = vadd.xlane.f32.xlu0 %v182_v62 }
 0x13d   :  { %v139_v55 = vpop.xlane.xlu1 %138 }
 0x13e   :  { %v140_v49 = vrot.slane %v139_v55, 4 }
 0x140   :  { %v141_v63 = vadd.f32 %v140_v49, %v139_v55 }
 0x142   :  { %v142_v32 = vrot.slane %v141_v63, 2 }
 0x144   :  { %v143_v5 = vadd.f32 %v142_v32, %v141_v63 }
 0x146   :  { %v144_v56 = vrot.slane %v143_v5, 1 }
 0x148   :  { %v145_v12 = vadd.f32 %v144_v56, %v143_v5 }
 0x15c   :  { %v116_v3 = vpop.xlane.xlu0 %115 }
 0x15d   :  { %v117_v4 = vrot.slane %v116_v3, 4 }
 0x15f   :  { %v118_v7 = vadd.f32 %v117_v4, %v116_v3 }
 0x161   :  { %v119_v39 = vrot.slane %v118_v7, 2 }
 0x162   :  { %v184_v8 = vpop.xlane.xlu0 %183 }
 0x163   :  { %v185_v6 = vrot.slane %v184_v8, 4  ;;  %v120_v9 = vadd.f32 %v119_v39, %v118_v7 }
 0x165   :  { %v186_v10 = vadd.f32 %v185_v6, %v184_v8  ;;  %v121_v11 = vrot.slane %v120_v9, 1 }
 0x167   :  { %v187_v13 = vrot.slane %v186_v10, 2  ;;  %v122_v14 = vadd.f32 %v121_v11, %v120_v9 }
 0x169   :  { %v188_v1 = vadd.f32 %v187_v13, %v186_v10  ;;  %208 = vpush %v122_v14 }
 0x16a   :  { %210 = vpush %v145_v12 }
 0x16b   :  { %v189_v15 = vrot.slane %v188_v1, 1 }
 0x16d   :  { %v190_v2 = vadd.f32 %v189_v15, %v188_v1 }
 0x16f   :  { %212 = vpush %v190_v2 }
 0x19a   :  { %s209_s0 = spop %208 }
 0x19b   :  { %s211_s1 = spop %210  ;;  %v201_v20 = vstv %s209_s0 }
 0x19c   :  { %v197_v17 = vstv %s211_s1 }
 0x19d   :  { %v198_v18 = vsel %vm196_vm4, %v197_v17, 0.0 }
 0x1a0   :  { %s213_s15 = spop %212 }
 0x1a1   :  { %v199_v19 = vstv %s213_s15 }
 0x1a2   :  { %v200_v21 = vsel %vm195_vm5, %v199_v19, %v198_v18 }
 0x1a3   :  { %v202_v22 = vsel %vm194_vm6, %v201_v20, %v200_v21 }
 0x1a4   :  { %203 = vst [vmem:[%s327_s2] sm:$0xff] %v202_v22 }

</bundles_post_ra>
